<compile_context>
chip_gen: v6e
topology: v6e:2x2x1
jax: 0.10.0
libtpu: 0.0.40
codegen_flags: <defaults>
</compile_context>

<pallas_src>
import functools

import jax
import jax.numpy as jnp
from jax.experimental import pallas as pl
from jax.experimental.pallas import tpu as pltpu

# Small synthetic GPT-2 config.
CFG = dict(
    vocab_size=128,
    n_positions=16,
    n_embd=32,
    n_head=4,
    n_layer=2,
    n_inner=None,          # -> 4 * n_embd
    layer_norm_epsilon=1e-5,
)

MM_DTYPE = jnp.bfloat16    # MXU operand dtype; accumulation is always fp32.

_PARALLEL_B = pltpu.CompilerParams(dimension_semantics=("parallel",))


def _full_spec(shape):
    """Whole-array block (block dims equal full array dims)."""
    return pl.BlockSpec(shape, lambda *_: (0,) * len(shape))


def _row_spec(S, last):
    """One (1, S, last) slice per grid step along the batch axis."""
    return pl.BlockSpec((1, S, last), lambda b: (b, 0, 0))


def _ln(x, g, b, eps):
    """fp32 layernorm over the last axis (biased variance, like torch)."""
    mu = jnp.mean(x, axis=-1, keepdims=True)
    var = jnp.mean((x - mu) ** 2, axis=-1, keepdims=True)
    return (x - mu) * jax.lax.rsqrt(var + eps) * g + b


# ----------------------- fused transformer-block kernels --------------------

def _attn_block_kernel(h_ref, ln_g, ln_b, qkv_w, qkv_b, proj_w, proj_b,
                       causal_ref, pad_ref, o_ref, *, eps, n_head):
    """ln_1 + fused QKV + causal MHA + out-proj + residual, one batch row."""
    h = h_ref[0].astype(jnp.float32)                       # (S, D)
    D = h.shape[-1]
    Dh = D // n_head

    x = _ln(h, ln_g[...], ln_b[...], eps)

    # Fused QKV projection: one MXU pass, x loaded once.
    qkv = jnp.dot(x.astype(MM_DTYPE), qkv_w[...].astype(MM_DTYPE),
                  preferred_element_type=jnp.float32) + qkv_b[...]   # (S, 3D)

    causal = causal_ref[...] > 0.0                          # (S, S) bool
    pad = pad_ref[0]                                        # (1, S) additive
    scale = 1.0 / float(Dh) ** 0.5

    outs = []
    for hd in range(n_head):                                # static unrolled
        q = qkv[:, hd * Dh:(hd + 1) * Dh]
        k = qkv[:, D + hd * Dh:D + (hd + 1) * Dh]
        v = qkv[:, 2 * D + hd * Dh:2 * D + (hd + 1) * Dh]
        s = jnp.dot(q.astype(MM_DTYPE), k.astype(MM_DTYPE).T,
                    preferred_element_type=jnp.float32) * scale
        # HF GPT-2 semantics: replace causally-masked logits with -10000.0,
        # then ADD the (already additive) padding mask.
        s = jnp.where(causal, s, jnp.float32(-10000.0)) + pad
        mx = jnp.max(s, axis=-1, keepdims=True)
        e = jnp.exp(s - mx)
        inv = pl.reciprocal(jnp.sum(e, axis=-1, keepdims=True), approx=True)
        p = e * inv
        outs.append(jnp.dot(p.astype(MM_DTYPE), v.astype(MM_DTYPE),
                            preferred_element_type=jnp.float32))
    attn = jnp.concatenate(outs, axis=-1)                   # (S, D)

    proj = jnp.dot(attn.astype(MM_DTYPE), proj_w[...].astype(MM_DTYPE),
                   preferred_element_type=jnp.float32) + proj_b[...]
    o_ref[0] = (proj + h).astype(o_ref.dtype)               # residual fused


def attn_block(hidden, blk, causal, pad_mask, eps, n_head):
    B, S, D = hidden.shape
    return pl.pallas_call(
        functools.partial(_attn_block_kernel, eps=eps, n_head=n_head),
        out_shape=jax.ShapeDtypeStruct((B, S, D), hidden.dtype),
        grid=(B,),
        in_specs=[
            _row_spec(S, D),
            _full_spec((1, D)), _full_spec((1, D)),
            _full_spec((D, 3 * D)), _full_spec((1, 3 * D)),
            _full_spec((D, D)), _full_spec((1, D)),
            _full_spec((S, S)),
            pl.BlockSpec((1, 1, S), lambda b: (b, 0, 0)),
        ],
        out_specs=_row_spec(S, D),
        compiler_params=_PARALLEL_B,
    )(hidden, blk["ln1_g"], blk["ln1_b"], blk["qkv_w"], blk["qkv_b"],
      blk["proj_w"], blk["proj_b"], causal, pad_mask)


def _mlp_block_kernel(h_ref, ln_g, ln_b, fc_w, fc_b, proj_w, proj_b, o_ref,
                      *, eps):
    """ln_2 + fc + ReLU + mlp-proj + residual, one batch row."""
    h = h_ref[0].astype(jnp.float32)                        # (S, D)
    x = _ln(h, ln_g[...], ln_b[...], eps)
    a = jnp.dot(x.astype(MM_DTYPE), fc_w[...].astype(MM_DTYPE),
                preferred_element_type=jnp.float32) + fc_b[...]      # (S, 4D)
    a = jnp.maximum(a, 0.0)                                 # ReLU (per spec)
    y = jnp.dot(a.astype(MM_DTYPE), proj_w[...].astype(MM_DTYPE),
                preferred_element_type=jnp.float32) + proj_b[...]
    o_ref[0] = (y + h).astype(o_ref.dtype)                  # residual fused


def mlp_block(hidden, blk, eps):
    B, S, D = hidden.shape
    inner = blk["fc_w"].shape[1]
    return pl.pallas_call(
        functools.partial(_mlp_block_kernel, eps=eps),
        out_shape=jax.ShapeDtypeStruct((B, S, D), hidden.dtype),
        grid=(B,),
        in_specs=[
            _row_spec(S, D),
            _full_spec((1, D)), _full_spec((1, D)),
            _full_spec((D, inner)), _full_spec((1, inner)),
            _full_spec((inner, D)), _full_spec((1, D)),
        ],
        out_specs=_row_spec(S, D),
        compiler_params=_PARALLEL_B,
    )(hidden, blk["ln2_g"], blk["ln2_b"], blk["fc_w"], blk["fc_b"],
      blk["mlp_proj_w"], blk["mlp_proj_b"])


def _lm_head_kernel(h_ref, ln_g, ln_b, wte_ref, o_ref, *, eps):
    """ln_f + tied lm_head (logits = x @ wte.T without materializing wte.T)."""
    h = h_ref[0].astype(jnp.float32)                        # (S, D)
    x = _ln(h, ln_g[...], ln_b[...], eps)
    logits = jax.lax.dot_general(
        x.astype(MM_DTYPE), wte_ref[...].astype(MM_DTYPE),
        (((1,), (1,)), ((), ())),                            # contract D with D
        preferred_element_type=jnp.float32)                 # (S, V)
    o_ref[0] = logits.astype(o_ref.dtype)


def lm_head(hidden, lnf_g, lnf_b, wte, eps):
    B, S, D = hidden.shape
    V = wte.shape[0]
    return pl.pallas_call(
        functools.partial(_lm_head_kernel, eps=eps),
        out_shape=jax.ShapeDtypeStruct((B, S, V), jnp.float32),
        grid=(B,),
        in_specs=[
            _row_spec(S, D),
            _full_spec((1, D)), _full_spec((1, D)),
            _full_spec((V, D)),
        ],
        out_specs=_row_spec(S, V),
        compiler_params=_PARALLEL_B,
    )(hidden, lnf_g, lnf_b, wte)


def _ce_kernel(logits_ref, labels_ref, loss_ref):
    logits = logits_ref[...].astype(jnp.float32)            # (N, V)
    labels = labels_ref[...]                                # (N, 1) int32
    m = jnp.max(logits, axis=-1, keepdims=True)
    lse = jnp.log(jnp.sum(jnp.exp(logits - m), axis=-1, keepdims=True)) + m
    col = jax.lax.broadcasted_iota(jnp.int32, logits.shape, 1)
    onehot = (col == labels).astype(jnp.float32)
    picked = jnp.sum(onehot * logits, axis=-1, keepdims=True)
    valid = (labels != -100).astype(jnp.float32)            # ignore_index=-100
    per = (lse - picked) * valid
    loss = jnp.sum(per) / jnp.maximum(jnp.sum(valid), 1.0)
    loss_ref[...] = loss.reshape(1, 1)


def cross_entropy(logits2d, labels2d):
    N, V = logits2d.shape
    out = pl.pallas_call(
        _ce_kernel,
        out_shape=jax.ShapeDtypeStruct((1, 1), jnp.float32),
        grid=(1,),
        in_specs=[_full_spec((N, V)), _full_spec((N, 1))],
        out_specs=_full_spec((1, 1)),
    )(logits2d, labels2d)
    return out[0, 0]


# ------------------------- parameters & forward -----------------------------

def init_params(key, cfg):
    D = cfg["n_embd"]
    V = cfg["vocab_size"]
    P = cfg["n_positions"]
    L = cfg["n_layer"]
    inner = cfg["n_inner"] if cfg["n_inner"] is not None else 4 * D

    keys = jax.random.split(key, 2 + L)
    params = {
        "wte": 0.02 * jax.random.normal(keys[0], (V, D), jnp.float32),
        "wpe": 0.02 * jax.random.normal(keys[1], (P, D), jnp.float32),
        "lnf_g": jnp.ones((1, D), jnp.float32),
        "lnf_b": jnp.zeros((1, D), jnp.float32),
    }
    blocks = []
    for l in range(L):
        ks = jax.random.split(keys[2 + l], 6)
        # Q/K/V weights pre-fused into a single [D, 3D] Conv1D-style weight.
        q_w = 0.02 * jax.random.normal(ks[0], (D, D), jnp.float32)
        k_w = 0.02 * jax.random.normal(ks[1], (D, D), jnp.float32)
        v_w = 0.02 * jax.random.normal(ks[2], (D, D), jnp.float32)
        blocks.append(dict(
            ln1_g=jnp.ones((1, D), jnp.float32), ln1_b=jnp.zeros((1, D), jnp.float32),
            ln2_g=jnp.ones((1, D), jnp.float32), ln2_b=jnp.zeros((1, D), jnp.float32),
            qkv_w=jnp.concatenate([q_w, k_w, v_w], axis=1),          # (D, 3D)
            qkv_b=jnp.zeros((1, 3 * D), jnp.float32),
            proj_w=0.02 * jax.random.normal(ks[3], (D, D), jnp.float32),
            proj_b=jnp.zeros((1, D), jnp.float32),
            fc_w=0.02 * jax.random.normal(ks[4], (D, inner), jnp.float32),
            fc_b=jnp.zeros((1, inner), jnp.float32),
            mlp_proj_w=0.02 * jax.random.normal(ks[5], (inner, D), jnp.float32),
            mlp_proj_b=jnp.zeros((1, D), jnp.float32),
        ))
    params["blocks"] = blocks
    return params


def gpt2_lm_forward(params, input_ids, attention_mask=None, position_ids=None,
                    labels=None, cfg=CFG):
    B, S = input_ids.shape
    D = cfg["n_embd"]
    H = cfg["n_head"]
    eps = cfg["layer_norm_epsilon"]

    if position_ids is None:
        position_ids = jnp.arange(S, dtype=jnp.int32)[None, :]
    position_ids = jnp.broadcast_to(position_ids, (B, S))

    # Additive padding mask (B, 1, S); causal mask built ONCE here (not per
    # grid step inside the kernel).
    if attention_mask is not None:
        am = attention_mask.reshape(B, -1).astype(jnp.float32)
        pad_mask = (1.0 - am)[:, None, :] * -10000.0
    else:
        pad_mask = jnp.zeros((B, 1, S), jnp.float32)
    row = jax.lax.broadcasted_iota(jnp.int32, (S, S), 0)
    col = jax.lax.broadcasted_iota(jnp.int32, (S, S), 1)
    causal = (col <= row).astype(jnp.float32)               # (S, S) tril

    # Embedding gathers are glue (plain JAX); dropout p=0 -> identity.
    hidden = (jnp.take(params["wte"], input_ids, axis=0)
              + jnp.take(params["wpe"], position_ids, axis=0))  # (B, S, D)

    for blk in params["blocks"]:
        hidden = attn_block(hidden, blk, causal, pad_mask, eps, H)
        hidden = mlp_block(hidden, blk, eps)

    logits = lm_head(hidden, params["lnf_g"], params["lnf_b"],
                     params["wte"], eps)                    # (B, S, V)

    loss = None
    if labels is not None:
        V = logits.shape[-1]
        shift_logits = logits[:, :-1, :].reshape(-1, V)
        shift_labels = labels[:, 1:].reshape(-1, 1).astype(jnp.int32)
        loss = cross_entropy(shift_logits, shift_labels)
    return loss, logits


if __name__ == "__main__":
    key = jax.random.PRNGKey(0)
    pkey, ikey = jax.random.split(key)
    params = init_params(pkey, CFG)

    B, S = 2, 8
    input_ids = jax.random.randint(ikey, (B, S), 0, CFG["vocab_size"],
                                   dtype=jnp.int32)
    attention_mask = jnp.ones((B, S), jnp.float32)
    labels = input_ids

    loss, logits = gpt2_lm_forward(params, input_ids,
                                   attention_mask=attention_mask,
                                   labels=labels)
    jax.block_until_ready((loss, logits))
    assert logits.shape == (B, S, CFG["vocab_size"])
    assert loss.shape == ()
    print("KERNEL_OK")
</pallas_src>

<mosaic_0001>
module attributes {stable_mosaic.version = 11 : i64} {
  func.func @_attn_block_kernel(%arg0: i32, %arg1: memref<1x8x32xf32, #tpu.memory_space<vmem>>, %arg2: memref<1x32xf32, #tpu.memory_space<vmem>>, %arg3: memref<1x32xf32, #tpu.memory_space<vmem>>, %arg4: memref<32x96xf32, #tpu.memory_space<vmem>>, %arg5: memref<1x96xf32, #tpu.memory_space<vmem>>, %arg6: memref<32x32xf32, #tpu.memory_space<vmem>>, %arg7: memref<1x32xf32, #tpu.memory_space<vmem>>, %arg8: memref<8x8xf32, #tpu.memory_space<vmem>>, %arg9: memref<1x1x8xf32, #tpu.memory_space<vmem>>, %arg10: memref<1x8x32xf32, #tpu.memory_space<vmem>>) attributes {dimension_semantics = [#tpu.dimension_semantics<parallel>], iteration_bounds = array<i64: 2>, scalar_prefetch = 0 : i64, scratch_operands = 0 : i64, tpu.core_type = #tpu.core_type<tc>, window_params = [{transform_indices = @transform_0, window_bounds = array<i64: 1, 8, 32>}, {pipeline_mode = #tpu.pipeline_mode<synchronous>, transform_indices = @transform_1, window_bounds = array<i64: 1, 32>}, {pipeline_mode = #tpu.pipeline_mode<synchronous>, transform_indices = @transform_2, window_bounds = array<i64: 1, 32>}, {pipeline_mode = #tpu.pipeline_mode<synchronous>, transform_indices = @transform_3, window_bounds = array<i64: 32, 96>}, {pipeline_mode = #tpu.pipeline_mode<synchronous>, transform_indices = @transform_4, window_bounds = array<i64: 1, 96>}, {pipeline_mode = #tpu.pipeline_mode<synchronous>, transform_indices = @transform_5, window_bounds = array<i64: 32, 32>}, {pipeline_mode = #tpu.pipeline_mode<synchronous>, transform_indices = @transform_6, window_bounds = array<i64: 1, 32>}, {pipeline_mode = #tpu.pipeline_mode<synchronous>, transform_indices = @transform_7, window_bounds = array<i64: 8, 8>}, {transform_indices = @transform_8, window_bounds = array<i64: 1, 1, 8>}, {transform_indices = @transform_9, window_bounds = array<i64: 1, 8, 32>}]} {
    %c0 = arith.constant 0 : index
    %c0_0 = arith.constant 0 : index
    %c0_1 = arith.constant 0 : index
    %0 = vector.load %arg1[%c0, %c0_0, %c0_1] : memref<1x8x32xf32, #tpu.memory_space<vmem>>, vector<1x8x32xf32>
    %1 = vector.shape_cast %0 : vector<1x8x32xf32> to vector<8x32xf32>
    %c0_2 = arith.constant 0 : index
    %c0_3 = arith.constant 0 : index
    %2 = vector.load %arg2[%c0_2, %c0_3] : memref<1x32xf32, #tpu.memory_space<vmem>>, vector<1x32xf32>
    %c0_4 = arith.constant 0 : index
    %c0_5 = arith.constant 0 : index
    %3 = vector.load %arg3[%c0_4, %c0_5] : memref<1x32xf32, #tpu.memory_space<vmem>>, vector<1x32xf32>
    %cst = arith.constant dense<0.000000e+00> : vector<8xf32>
    %4 = vector.multi_reduction <add>, %1, %cst [1] : vector<8x32xf32> to vector<8xf32>
    %5 = vector.shape_cast %4 : vector<8xf32> to vector<8x1xf32>
    %cst_6 = arith.constant 3.200000e+01 : f32
    %6 = vector.broadcast %cst_6 : f32 to vector<8x1xf32>
    %7 = arith.divf %5, %6 : vector<8x1xf32>
    %8 = vector.broadcast %7 : vector<8x1xf32> to vector<8x32xf32>
    %9 = arith.subf %1, %8 : vector<8x32xf32>
    %10 = arith.mulf %9, %9 : vector<8x32xf32>
    %cst_7 = arith.constant dense<0.000000e+00> : vector<8xf32>
    %11 = vector.multi_reduction <add>, %10, %cst_7 [1] : vector<8x32xf32> to vector<8xf32>
    %12 = vector.shape_cast %11 : vector<8xf32> to vector<8x1xf32>
    %cst_8 = arith.constant 3.200000e+01 : f32
    %13 = vector.broadcast %cst_8 : f32 to vector<8x1xf32>
    %14 = arith.divf %12, %13 : vector<8x1xf32>
    %15 = vector.broadcast %7 : vector<8x1xf32> to vector<8x32xf32>
    %16 = arith.subf %1, %15 : vector<8x32xf32>
    %cst_9 = arith.constant 9.99999974E-6 : f32
    %17 = vector.broadcast %cst_9 : f32 to vector<8x1xf32>
    %18 = arith.addf %14, %17 : vector<8x1xf32>
    %19 = math.rsqrt %18 : vector<8x1xf32>
    %20 = vector.broadcast %19 : vector<8x1xf32> to vector<8x32xf32>
    %21 = arith.mulf %16, %20 : vector<8x32xf32>
    %22 = vector.broadcast %2 : vector<1x32xf32> to vector<8x32xf32>
    %23 = arith.mulf %21, %22 : vector<8x32xf32>
    %24 = vector.broadcast %3 : vector<1x32xf32> to vector<8x32xf32>
    %25 = arith.addf %23, %24 : vector<8x32xf32>
    %26 = arith.truncf %25 : vector<8x32xf32> to vector<8x32xbf16>
    %c0_10 = arith.constant 0 : index
    %c0_11 = arith.constant 0 : index
    %27 = vector.load %arg4[%c0_10, %c0_11] : memref<32x96xf32, #tpu.memory_space<vmem>>, vector<32x96xf32>
    %28 = arith.truncf %27 : vector<32x96xf32> to vector<32x96xbf16>
    %cst_12 = arith.constant dense<0.000000e+00> : vector<8x96xf32>
    %29 = tpu.matmul %26, %28, %cst_12 {dimension_numbers = #tpu.dot_dimension_numbers<[1], [0], [0], [1], [0, 0, 1, 1], [], []>} : vector<8x32xbf16>, vector<32x96xbf16>, vector<8x96xf32> -> vector<8x96xf32>
    %c0_13 = arith.constant 0 : index
    %c0_14 = arith.constant 0 : index
    %30 = vector.load %arg5[%c0_13, %c0_14] : memref<1x96xf32, #tpu.memory_space<vmem>>, vector<1x96xf32>
    %31 = vector.broadcast %30 : vector<1x96xf32> to vector<8x96xf32>
    %32 = arith.addf %29, %31 : vector<8x96xf32>
    %c0_15 = arith.constant 0 : index
    %c0_16 = arith.constant 0 : index
    %33 = vector.load %arg8[%c0_15, %c0_16] : memref<8x8xf32, #tpu.memory_space<vmem>>, vector<8x8xf32>
    %cst_17 = arith.constant 0.000000e+00 : f32
    %34 = vector.broadcast %cst_17 : f32 to vector<8x8xf32>
    %35 = arith.cmpf ogt, %33, %34 : vector<8x8xf32>
    %c0_18 = arith.constant 0 : index
    %c0_19 = arith.constant 0 : index
    %c0_20 = arith.constant 0 : index
    %36 = vector.load %arg9[%c0_18, %c0_19, %c0_20] : memref<1x1x8xf32, #tpu.memory_space<vmem>>, vector<1x1x8xf32>
    %37 = vector.shape_cast %36 : vector<1x1x8xf32> to vector<1x8xf32>
    %38 = vector.extract_strided_slice %32 {offsets = [0, 0], sizes = [8, 8], strides = [1, 1]} : vector<8x96xf32> to vector<8x8xf32>
    %39 = vector.extract_strided_slice %32 {offsets = [0, 32], sizes = [8, 8], strides = [1, 1]} : vector<8x96xf32> to vector<8x8xf32>
    %40 = vector.extract_strided_slice %32 {offsets = [0, 64], sizes = [8, 8], strides = [1, 1]} : vector<8x96xf32> to vector<8x8xf32>
    %41 = arith.truncf %38 : vector<8x8xf32> to vector<8x8xbf16>
    %42 = arith.truncf %39 : vector<8x8xf32> to vector<8x8xbf16>
    %43 = tpu.transpose %42, [1, 0] : vector<8x8xbf16> -> vector<8x8xbf16>
    %cst_21 = arith.constant dense<0.000000e+00> : vector<8x8xf32>
    %44 = tpu.matmul %41, %43, %cst_21 {dimension_numbers = #tpu.dot_dimension_numbers<[1], [0], [0], [1], [0, 0, 1, 1], [], []>} : vector<8x8xbf16>, vector<8x8xbf16>, vector<8x8xf32> -> vector<8x8xf32>
    %cst_22 = arith.constant 0.353553385 : f32
    %45 = vector.broadcast %cst_22 : f32 to vector<8x8xf32>
    %46 = arith.mulf %44, %45 : vector<8x8xf32>
    %cst_23 = arith.constant -1.000000e+04 : f32
    %47 = vector.broadcast %cst_23 : f32 to vector<8x8xf32>
    %48 = arith.select %35, %46, %47 : vector<8x8xi1>, vector<8x8xf32>
    %49 = vector.broadcast %37 : vector<1x8xf32> to vector<8x8xf32>
    %50 = arith.addf %48, %49 : vector<8x8xf32>
    %cst_24 = arith.constant dense<0xFF800000> : vector<8xf32>
    %51 = vector.multi_reduction <maximumf>, %50, %cst_24 [1] : vector<8x8xf32> to vector<8xf32>
    %52 = vector.shape_cast %51 : vector<8xf32> to vector<8x1xf32>
    %53 = vector.broadcast %52 : vector<8x1xf32> to vector<8x8xf32>
    %54 = arith.subf %50, %53 : vector<8x8xf32>
    %55 = math.exp %54 : vector<8x8xf32>
    %cst_25 = arith.constant dense<0.000000e+00> : vector<8xf32>
    %56 = vector.multi_reduction <add>, %55, %cst_25 [1] : vector<8x8xf32> to vector<8xf32>
    %57 = vector.shape_cast %56 : vector<8xf32> to vector<8x1xf32>
    %58 = tpu.reciprocal %57 {approx = true} : vector<8x1xf32> -> vector<8x1xf32>
    %59 = vector.broadcast %58 : vector<8x1xf32> to vector<8x8xf32>
    %60 = arith.mulf %55, %59 : vector<8x8xf32>
    %61 = arith.truncf %60 : vector<8x8xf32> to vector<8x8xbf16>
    %62 = arith.truncf %40 : vector<8x8xf32> to vector<8x8xbf16>
    %cst_26 = arith.constant dense<0.000000e+00> : vector<8x8xf32>
    %63 = tpu.matmul %61, %62, %cst_26 {dimension_numbers = #tpu.dot_dimension_numbers<[1], [0], [0], [1], [0, 0, 1, 1], [], []>} : vector<8x8xbf16>, vector<8x8xbf16>, vector<8x8xf32> -> vector<8x8xf32>
    %64 = vector.extract_strided_slice %32 {offsets = [0, 8], sizes = [8, 8], strides = [1, 1]} : vector<8x96xf32> to vector<8x8xf32>
    %65 = vector.extract_strided_slice %32 {offsets = [0, 40], sizes = [8, 8], strides = [1, 1]} : vector<8x96xf32> to vector<8x8xf32>
    %66 = vector.extract_strided_slice %32 {offsets = [0, 72], sizes = [8, 8], strides = [1, 1]} : vector<8x96xf32> to vector<8x8xf32>
    %67 = arith.truncf %64 : vector<8x8xf32> to vector<8x8xbf16>
    %68 = arith.truncf %65 : vector<8x8xf32> to vector<8x8xbf16>
    %69 = tpu.transpose %68, [1, 0] : vector<8x8xbf16> -> vector<8x8xbf16>
    %cst_27 = arith.constant dense<0.000000e+00> : vector<8x8xf32>
    %70 = tpu.matmul %67, %69, %cst_27 {dimension_numbers = #tpu.dot_dimension_numbers<[1], [0], [0], [1], [0, 0, 1, 1], [], []>} : vector<8x8xbf16>, vector<8x8xbf16>, vector<8x8xf32> -> vector<8x8xf32>
    %cst_28 = arith.constant 0.353553385 : f32
    %71 = vector.broadcast %cst_28 : f32 to vector<8x8xf32>
    %72 = arith.mulf %70, %71 : vector<8x8xf32>
    %cst_29 = arith.constant -1.000000e+04 : f32
    %73 = vector.broadcast %cst_29 : f32 to vector<8x8xf32>
    %74 = arith.select %35, %72, %73 : vector<8x8xi1>, vector<8x8xf32>
    %75 = vector.broadcast %37 : vector<1x8xf32> to vector<8x8xf32>
    %76 = arith.addf %74, %75 : vector<8x8xf32>
    %cst_30 = arith.constant dense<0xFF800000> : vector<8xf32>
    %77 = vector.multi_reduction <maximumf>, %76, %cst_30 [1] : vector<8x8xf32> to vector<8xf32>
    %78 = vector.shape_cast %77 : vector<8xf32> to vector<8x1xf32>
    %79 = vector.broadcast %78 : vector<8x1xf32> to vector<8x8xf32>
    %80 = arith.subf %76, %79 : vector<8x8xf32>
    %81 = math.exp %80 : vector<8x8xf32>
    %cst_31 = arith.constant dense<0.000000e+00> : vector<8xf32>
    %82 = vector.multi_reduction <add>, %81, %cst_31 [1] : vector<8x8xf32> to vector<8xf32>
    %83 = vector.shape_cast %82 : vector<8xf32> to vector<8x1xf32>
    %84 = tpu.reciprocal %83 {approx = true} : vector<8x1xf32> -> vector<8x1xf32>
    %85 = vector.broadcast %84 : vector<8x1xf32> to vector<8x8xf32>
    %86 = arith.mulf %81, %85 : vector<8x8xf32>
    %87 = arith.truncf %86 : vector<8x8xf32> to vector<8x8xbf16>
    %88 = arith.truncf %66 : vector<8x8xf32> to vector<8x8xbf16>
    %cst_32 = arith.constant dense<0.000000e+00> : vector<8x8xf32>
    %89 = tpu.matmul %87, %88, %cst_32 {dimension_numbers = #tpu.dot_dimension_numbers<[1], [0], [0], [1], [0, 0, 1, 1], [], []>} : vector<8x8xbf16>, vector<8x8xbf16>, vector<8x8xf32> -> vector<8x8xf32>
    %90 = vector.extract_strided_slice %32 {offsets = [0, 16], sizes = [8, 8], strides = [1, 1]} : vector<8x96xf32> to vector<8x8xf32>
    %91 = vector.extract_strided_slice %32 {offsets = [0, 48], sizes = [8, 8], strides = [1, 1]} : vector<8x96xf32> to vector<8x8xf32>
    %92 = vector.extract_strided_slice %32 {offsets = [0, 80], sizes = [8, 8], strides = [1, 1]} : vector<8x96xf32> to vector<8x8xf32>
    %93 = arith.truncf %90 : vector<8x8xf32> to vector<8x8xbf16>
    %94 = arith.truncf %91 : vector<8x8xf32> to vector<8x8xbf16>
    %95 = tpu.transpose %94, [1, 0] : vector<8x8xbf16> -> vector<8x8xbf16>
    %cst_33 = arith.constant dense<0.000000e+00> : vector<8x8xf32>
    %96 = tpu.matmul %93, %95, %cst_33 {dimension_numbers = #tpu.dot_dimension_numbers<[1], [0], [0], [1], [0, 0, 1, 1], [], []>} : vector<8x8xbf16>, vector<8x8xbf16>, vector<8x8xf32> -> vector<8x8xf32>
    %cst_34 = arith.constant 0.353553385 : f32
    %97 = vector.broadcast %cst_34 : f32 to vector<8x8xf32>
    %98 = arith.mulf %96, %97 : vector<8x8xf32>
    %cst_35 = arith.constant -1.000000e+04 : f32
    %99 = vector.broadcast %cst_35 : f32 to vector<8x8xf32>
    %100 = arith.select %35, %98, %99 : vector<8x8xi1>, vector<8x8xf32>
    %101 = vector.broadcast %37 : vector<1x8xf32> to vector<8x8xf32>
    %102 = arith.addf %100, %101 : vector<8x8xf32>
    %cst_36 = arith.constant dense<0xFF800000> : vector<8xf32>
    %103 = vector.multi_reduction <maximumf>, %102, %cst_36 [1] : vector<8x8xf32> to vector<8xf32>
    %104 = vector.shape_cast %103 : vector<8xf32> to vector<8x1xf32>
    %105 = vector.broadcast %104 : vector<8x1xf32> to vector<8x8xf32>
    %106 = arith.subf %102, %105 : vector<8x8xf32>
    %107 = math.exp %106 : vector<8x8xf32>
    %cst_37 = arith.constant dense<0.000000e+00> : vector<8xf32>
    %108 = vector.multi_reduction <add>, %107, %cst_37 [1] : vector<8x8xf32> to vector<8xf32>
    %109 = vector.shape_cast %108 : vector<8xf32> to vector<8x1xf32>
    %110 = tpu.reciprocal %109 {approx = true} : vector<8x1xf32> -> vector<8x1xf32>
    %111 = vector.broadcast %110 : vector<8x1xf32> to vector<8x8xf32>
    %112 = arith.mulf %107, %111 : vector<8x8xf32>
    %113 = arith.truncf %112 : vector<8x8xf32> to vector<8x8xbf16>
    %114 = arith.truncf %92 : vector<8x8xf32> to vector<8x8xbf16>
    %cst_38 = arith.constant dense<0.000000e+00> : vector<8x8xf32>
    %115 = tpu.matmul %113, %114, %cst_38 {dimension_numbers = #tpu.dot_dimension_numbers<[1], [0], [0], [1], [0, 0, 1, 1], [], []>} : vector<8x8xbf16>, vector<8x8xbf16>, vector<8x8xf32> -> vector<8x8xf32>
    %116 = vector.extract_strided_slice %32 {offsets = [0, 24], sizes = [8, 8], strides = [1, 1]} : vector<8x96xf32> to vector<8x8xf32>
    %117 = vector.extract_strided_slice %32 {offsets = [0, 56], sizes = [8, 8], strides = [1, 1]} : vector<8x96xf32> to vector<8x8xf32>
    %118 = vector.extract_strided_slice %32 {offsets = [0, 88], sizes = [8, 8], strides = [1, 1]} : vector<8x96xf32> to vector<8x8xf32>
    %119 = arith.truncf %116 : vector<8x8xf32> to vector<8x8xbf16>
    %120 = arith.truncf %117 : vector<8x8xf32> to vector<8x8xbf16>
    %121 = tpu.transpose %120, [1, 0] : vector<8x8xbf16> -> vector<8x8xbf16>
    %cst_39 = arith.constant dense<0.000000e+00> : vector<8x8xf32>
    %122 = tpu.matmul %119, %121, %cst_39 {dimension_numbers = #tpu.dot_dimension_numbers<[1], [0], [0], [1], [0, 0, 1, 1], [], []>} : vector<8x8xbf16>, vector<8x8xbf16>, vector<8x8xf32> -> vector<8x8xf32>
    %cst_40 = arith.constant 0.353553385 : f32
    %123 = vector.broadcast %cst_40 : f32 to vector<8x8xf32>
    %124 = arith.mulf %122, %123 : vector<8x8xf32>
    %cst_41 = arith.constant -1.000000e+04 : f32
    %125 = vector.broadcast %cst_41 : f32 to vector<8x8xf32>
    %126 = arith.select %35, %124, %125 : vector<8x8xi1>, vector<8x8xf32>
    %127 = vector.broadcast %37 : vector<1x8xf32> to vector<8x8xf32>
    %128 = arith.addf %126, %127 : vector<8x8xf32>
    %cst_42 = arith.constant dense<0xFF800000> : vector<8xf32>
    %129 = vector.multi_reduction <maximumf>, %128, %cst_42 [1] : vector<8x8xf32> to vector<8xf32>
    %130 = vector.shape_cast %129 : vector<8xf32> to vector<8x1xf32>
    %131 = vector.broadcast %130 : vector<8x1xf32> to vector<8x8xf32>
    %132 = arith.subf %128, %131 : vector<8x8xf32>
    %133 = math.exp %132 : vector<8x8xf32>
    %cst_43 = arith.constant dense<0.000000e+00> : vector<8xf32>
    %134 = vector.multi_reduction <add>, %133, %cst_43 [1] : vector<8x8xf32> to vector<8xf32>
    %135 = vector.shape_cast %134 : vector<8xf32> to vector<8x1xf32>
    %136 = tpu.reciprocal %135 {approx = true} : vector<8x1xf32> -> vector<8x1xf32>
    %137 = vector.broadcast %136 : vector<8x1xf32> to vector<8x8xf32>
    %138 = arith.mulf %133, %137 : vector<8x8xf32>
    %139 = arith.truncf %138 : vector<8x8xf32> to vector<8x8xbf16>
    %140 = arith.truncf %118 : vector<8x8xf32> to vector<8x8xbf16>
    %cst_44 = arith.constant dense<0.000000e+00> : vector<8x8xf32>
    %141 = tpu.matmul %139, %140, %cst_44 {dimension_numbers = #tpu.dot_dimension_numbers<[1], [0], [0], [1], [0, 0, 1, 1], [], []>} : vector<8x8xbf16>, vector<8x8xbf16>, vector<8x8xf32> -> vector<8x8xf32>
    %142 = tpu.concatenate %63, %89, %115, %141 in 1 : vector<8x8xf32>, vector<8x8xf32>, vector<8x8xf32>, vector<8x8xf32> -> vector<8x32xf32>
    %143 = arith.truncf %142 : vector<8x32xf32> to vector<8x32xbf16>
    %c0_45 = arith.constant 0 : index
    %c0_46 = arith.constant 0 : index
    %144 = vector.load %arg6[%c0_45, %c0_46] : memref<32x32xf32, #tpu.memory_space<vmem>>, vector<32x32xf32>
    %145 = arith.truncf %144 : vector<32x32xf32> to vector<32x32xbf16>
    %cst_47 = arith.constant dense<0.000000e+00> : vector<8x32xf32>
    %146 = tpu.matmul %143, %145, %cst_47 {dimension_numbers = #tpu.dot_dimension_numbers<[1], [0], [0], [1], [0, 0, 1, 1], [], []>} : vector<8x32xbf16>, vector<32x32xbf16>, vector<8x32xf32> -> vector<8x32xf32>
    %c0_48 = arith.constant 0 : index
    %c0_49 = arith.constant 0 : index
    %147 = vector.load %arg7[%c0_48, %c0_49] : memref<1x32xf32, #tpu.memory_space<vmem>>, vector<1x32xf32>
    %148 = vector.broadcast %147 : vector<1x32xf32> to vector<8x32xf32>
    %149 = arith.addf %146, %148 : vector<8x32xf32>
    %150 = arith.addf %149, %1 : vector<8x32xf32>
    %c0_50 = arith.constant 0 : index
    %c0_51 = arith.constant 0 : index
    %c0_52 = arith.constant 0 : index
    %151 = vector.load %arg10[%c0_50, %c0_51, %c0_52] : memref<1x8x32xf32, #tpu.memory_space<vmem>>, vector<1x8x32xf32>
    %152 = vector.shape_cast %151 : vector<1x8x32xf32> to vector<8x32xf32>
    %153 = vector.shape_cast %150 : vector<8x32xf32> to vector<1x8x32xf32>
    tpu.vector_store %arg10[%c0_50, %c0_51, %c0_52], %153 {strides = array<i32>} : memref<1x8x32xf32, #tpu.memory_space<vmem>>, vector<1x8x32xf32>,
    return
  }
  func.func @transform_0(%arg0: i32) -> (i32, i32, i32) {
    %c0_i32 = arith.constant 0 : i32
    %c0_i32_0 = arith.constant 0 : i32
    %c0_i32_1 = arith.constant 0 : i32
    return %arg0, %c0_i32, %c0_i32_0 : i32, i32, i32
  }
  func.func @transform_1(%arg0: i32) -> (i32, i32) {
    %c0_i32 = arith.constant 0 : i32
    %c0_i32_0 = arith.constant 0 : i32
    %c0_i32_1 = arith.constant 0 : i32
    return %c0_i32, %c0_i32_0 : i32, i32
  }
  func.func @transform_2(%arg0: i32) -> (i32, i32) {
    %c0_i32 = arith.constant 0 : i32
    %c0_i32_0 = arith.constant 0 : i32
    %c0_i32_1 = arith.constant 0 : i32
    return %c0_i32, %c0_i32_0 : i32, i32
  }
  func.func @transform_3(%arg0: i32) -> (i32, i32) {
    %c0_i32 = arith.constant 0 : i32
    %c0_i32_0 = arith.constant 0 : i32
    %c0_i32_1 = arith.constant 0 : i32
    return %c0_i32, %c0_i32_0 : i32, i32
  }
  func.func @transform_4(%arg0: i32) -> (i32, i32) {
    %c0_i32 = arith.constant 0 : i32
    %c0_i32_0 = arith.constant 0 : i32
    %c0_i32_1 = arith.constant 0 : i32
    return %c0_i32, %c0_i32_0 : i32, i32
  }
  func.func @transform_5(%arg0: i32) -> (i32, i32) {
    %c0_i32 = arith.constant 0 : i32
    %c0_i32_0 = arith.constant 0 : i32
    %c0_i32_1 = arith.constant 0 : i32
    return %c0_i32, %c0_i32_0 : i32, i32
  }
  func.func @transform_6(%arg0: i32) -> (i32, i32) {
    %c0_i32 = arith.constant 0 : i32
    %c0_i32_0 = arith.constant 0 : i32
    %c0_i32_1 = arith.constant 0 : i32
    return %c0_i32, %c0_i32_0 : i32, i32
  }
  func.func @transform_7(%arg0: i32) -> (i32, i32) {
    %c0_i32 = arith.constant 0 : i32
    %c0_i32_0 = arith.constant 0 : i32
    %c0_i32_1 = arith.constant 0 : i32
    return %c0_i32, %c0_i32_0 : i32, i32
  }
  func.func @transform_8(%arg0: i32) -> (i32, i32, i32) {
    %c0_i32 = arith.constant 0 : i32
    %c0_i32_0 = arith.constant 0 : i32
    %c0_i32_1 = arith.constant 0 : i32
    return %arg0, %c0_i32, %c0_i32_0 : i32, i32, i32
  }
  func.func @transform_9(%arg0: i32) -> (i32, i32, i32) {
    %c0_i32 = arith.constant 0 : i32
    %c0_i32_0 = arith.constant 0 : i32
    %c0_i32_1 = arith.constant 0 : i32
    return %arg0, %c0_i32, %c0_i32_0 : i32, i32, i32
  }
}

</mosaic_0001>

<bundles_post_ra>
// kernel: tpu_custom_call.1
= control target key start
LH: loop header
LB: loop body
LE: loop exit
PB: predicated region body
PF: predicated region fallthrough
CT: control target
= control target key end

     0   :  { %s2018_s0 = inlined_call_operand.hbm [shape: f32[2,8,32], index: 0, kind: input, shape index: {}]   ;;  %s2019_s1 = inlined_call_operand.vmem [shape: f32[1,32], index: 1, kind: input, shape index: {}]   ;;  %s2020_s2 = inlined_call_operand.hbm [shape: f32[1,32], index: 2, kind: input, shape index: {}]   ;;  %s2021_s3 = inlined_call_operand.hbm [shape: f32[32,96], index: 3, kind: input, shape index: {}]   ;;  %s2022_s4 = inlined_call_operand.vmem [shape: f32[1,96], index: 4, kind: input, shape index: {}]   ;;  %s2023_s5 = inlined_call_operand.hbm [shape: f32[32,32], index: 5, kind: input, shape index: {}]   ;;  %s2024_s6 = inlined_call_operand.hbm [shape: f32[1,32], index: 6, kind: input, shape index: {}]   ;;  %s2025_s7 = inlined_call_operand.vmem [shape: f32[8,8], index: 7, kind: input, shape index: {}]   ;;  %s2026_s8 = inlined_call_operand.vmem [shape: f32[2,1,8], index: 8, kind: input, shape index: {}]   ;;  %s2027_s9 = inlined_call_operand.hbm [shape: f32[2,8,32], index: 9, kind: output, shape index: {}]  }
   0x1   :  { %2032 = sst [smem:[#allocation16_spill]] %s2020_s2 }
   0x2   :  { %2033 = sst [smem:[#allocation17_spill]] %s2021_s3 }
   0x3   :  { %2034 = sst [smem:[#allocation18_spill]] %s2023_s5 }
   0x4   :  { %2035 = sst [smem:[#allocation19_spill]] %s2024_s6 }
   0x5   :  { %14 = vsyncpa [#allocation3], 0 }
   0x6   :  { %16 = vsyncpa [#allocation3 + $0x1], 0 }
   0x7   :  { %17 = vsyncpa [#allocation6], 0 }
   0x8   :  { %18 = vsyncpa [#allocation9], 0 }
   0x9   :  { %19 = vsyncpa [#allocation4], 0 }
   0xa   :  { %21 = vsyncpa [#allocation4 + $0x1], 0  ;;  %s1700_s30 = smov 0   ;;  %s1702_s10 = smov 0  }
   0xb   :  { %s1704_s11 = smov 0   ;;  %s1706_s12 = smov 0  }
   0xc LB: > { %s1626_s13 = smov [#allocation5]   ;;  %s1721_s15 = sadd.s32 4294967295, %s1624_s12   ;;  %s1624_s12 = sphi %s1706_s12, %s2059_s12   ;;  %s1620_s11 = sphi %s1704_s11, %s2058_s11   ;;  %s1616_s10 = sphi %s1702_s10, %s2057_s10   ;;  %s1612_s30 = sphi %s1700_s30, %s2056_s30  }
   0xd   : > { %s273_s14 = sshll.u32 %s1626_s13, 4  ;;  %p1177_p0 = scmp.ge.s32.totalorder %s1624_s12, 1  ;;  %s274_s14 = int_to_ptr.vmem [resolvable:$true] %s273_s14 }
   0xe   : > { %p2028_p1 = scmp.eq.s32.totalorder %s1721_s15, 0  ;;  %p257_p2 = scmp.lt.s32.totalorder %s1624_s12, 3 }
   0xf   : > { %s1627_s17 = smov [#allocation8]   ;;  %s1628_s20 = smov [#allocation7]  }
  0x10   : > { %p1726_p3 = pnand %p1177_p0, %p257_p2  ;;  %s299_s18 = sshll.u32 %s1627_s17, 4  ;;  %s1739_s18 = int_to_ptr.vmem [resolvable:$true] %s299_s18 }
  0x11   : > { %s283_s21 = sshll.u32 %s1628_s20, 4  ;;  %s1431_s22 = scalar_lea.vmem %s274_s14, 16  ;;  %s1741_s21 = int_to_ptr.vmem [resolvable:$true] %s283_s21 }
  0x12   : > { %s2036_s16 = scalar_select %p1726_p3, 1, 0 }
  0x13   : > { %p1317_p5 = pneg %p1726_p3  ;;  %p1432_p8 = scmp.ne.s32.totalorder %s274_s14, %s1431_s22 }
  0x14   : > { %s1438_s23 = scalar_lea.vmem %s274_s14, 32  ;;  %p1439_p11 = scmp.lt.s32.totalorder %s274_s14, %s274_s14 }
  0x15   : > { %p1735_p6 = pnand %p1317_p5, %p2028_p1  ;;  %p1440_p12 = scmp.lt.s32.totalorder %s1438_s23, %s1431_s22 }
  0x17   : > { %p1422_p7 = pneg %p1735_p6  ;;  %p1441_p13 = por %p1440_p12, %p1439_p11 }
  0x19   : > { %p1434_p9 = pnand %p1432_p8, %p1422_p7 }
  0x1b   : > { %p1435_p10 = pneg %p1434_p9 }
  0x1d   : > { %p1442_p0 = pnand %p1441_p13, %p1435_p10 }
  0x1f   : > { %1445 = shalt.err (!%p1442_p0)
}
  0x20   : > { %s2038_s2 = sld [smem:[#allocation16_spill]]  ;;  %s1457_s26 = scalar_lea.vmem %s1739_s18, 512 }
  0x21   : > { %p1458_p2 = scmp.ne.s32.totalorder %s1739_s18, %s1457_s26  ;;  %p1465_p9 = scmp.lt.s32.totalorder %s1739_s18, %s1739_s18 }
  0x22   : > { %p1466_p10 = scmp.lt.s32.totalorder %s1457_s26, %s1457_s26 }
  0x23   : > { %p1460_p5 = pnand %p1458_p2, %p1422_p7 }
  0x24   : > { %p1467_p11 = por %p1466_p10, %p1465_p9 }
  0x25   : > { %p1461_p8 = pneg %p1460_p5 }
  0x26   : > { %1320 = dma.hbm_to_vmem [thread:$0]  (!%p1735_p6), %s2038_s2, 16, %s274_s14, [#allocation6]  }
  0x27   : > { %p1468_p12 = pnand %p1467_p11, %p1461_p8 }
  0x29   : > { %1471 = shalt.err (!%p1468_p12)
}
  0x2a   : > { %s1629_s27 = smov 128   ;;  %s1630_s28 = smov 8  }
  0x2b   : > { %s2039_s5 = sld [smem:[#allocation18_spill]]  ;;  %s1483_s14 = scalar_lea.vmem %s1741_s21, 512 }
  0x2c   : > { %p1484_p13 = scmp.ne.s32.totalorder %s1741_s21, %s1483_s14  ;;  %p1491_p5 = scmp.lt.s32.totalorder %s1741_s21, %s1741_s21 }
  0x2d   : > { %p1492_p8 = scmp.lt.s32.totalorder %s1483_s14, %s1483_s14 }
  0x2e   : > { %p1486_p0 = pnand %p1484_p13, %p1422_p7 }
  0x2f   : > { %p1493_p9 = por %p1492_p8, %p1491_p5 }
  0x30   : > { %p1487_p2 = pneg %p1486_p0 }
  0x31   : > { %1326 = dma.hbm_to_vmem [thread:$0]  (!%p1735_p6), %s2039_s5, 512, %s1739_s18, [#allocation9], %s1629_s27, %s1629_s27, %s1630_s28  }
  0x32   : > { %p1494_p10 = pnand %p1493_p9, %p1487_p2 }
  0x34   : > { %1497 = shalt.err (!%p1494_p10)
}
  0x35   : > { %s2040_s3 = sld [smem:[#allocation17_spill]]  ;;  %s1631_s18 = smov [#allocation10]  }
  0x36   : > { %s313_s22 = sshll.u32 %s1631_s18, 4  ;;  %s314_s22 = int_to_ptr.vmem [resolvable:$true] %s313_s22 }
  0x37   : > { %s1509_s23 = scalar_lea.vmem %s314_s22, 16  ;;  %s1516_s24 = scalar_lea.vmem %s314_s22, 32 }
  0x38   : > { %p1510_p11 = scmp.ne.s32.totalorder %s314_s22, %s1509_s23  ;;  %p1517_p0 = scmp.lt.s32.totalorder %s314_s22, %s314_s22 }
  0x39   : > { %p1518_p2 = scmp.lt.s32.totalorder %s1516_s24, %s1509_s23 }
  0x3a   : > { %p1512_p12 = pnand %p1510_p11, %p1422_p7 }
  0x3b   : > { %1323 = dma.hbm_to_vmem [thread:$0]  (!%p1735_p6), %s2040_s3, 512, %s1741_s21, [#allocation6], %s1629_s27, %s1629_s27, %s1630_s28  }
  0x3c   : > { %p1513_p13 = pneg %p1512_p12  ;;  %p1519_p5 = por %p1518_p2, %p1517_p0 }
  0x3e   : > { %p1520_p8 = pnand %p1519_p5, %p1513_p13 }
  0x40   : > { %1523 = shalt.err (!%p1520_p8)
}
  0x41   : > { %s2041_s6 = sld [smem:[#allocation19_spill]]  ;;  %s1176_s21 = sadd.s32 4294967294, %s1624_s12  }
  0x42   : > { %s1789_s19 = sadd.s32 1, %s1624_s12   ;;  %s34_s28 = sadd.s32 1, %s1620_s11 }
  0x43   : > { %s31_s27 = ssub.s32 %s1624_s12, %s1789_s19  ;;  %p41_p9 = scmp.ne.s32.totalorder %s1620_s11, %s1616_s10 }
  0x44   : > { %p32_p7 = scmp.eq.s32.totalorder %s31_s27, 0  ;;  %p42_p10 = scmp.eq.s32.totalorder %s1624_s12, 0 }
  0x45   : > { %p47_p11 = scmp.ne.s32.totalorder %s1616_s10, %s1612_s30  ;;  %p244_p13 = scmp.eq.s32.totalorder %s1721_s15, 1 }
  0x46   : > { %s1800_s29 = scalar_select %p32_p7, %s1620_s11, %s34_s28  }
  0x47   : > { %1329 = dma.hbm_to_vmem [thread:$0]  (!%p1735_p6), %s2041_s6, 16, %s314_s22, [#allocation9]  }
  0x48   : > { %p1802_p12 = por %p42_p10, %p41_p9  ;;  %p1808_p6 = por %p2028_p1, %p47_p11 }
  0x49   : > { %p250_p0 = scmp.eq.s32.totalorder %s1176_s21, 1  ;;  %p1342_p2 = scmp.lt.s32.totalorder %s1624_s12, 2 }
  0x4a   : > { %s2043_s14 = scalar_select %p1808_p6, 1, 0 }
  0x4b   : > { %s327_s17 = sand.u32 1, %s1620_s11   ;;  %p1815_p5 = por %p244_p13, %p41_p9 }
  0x4c   : > { %p1819_p8 = por %p250_p0, %p47_p11  ;;  %s1183_s22 = sshll.u32 %s327_s17, 3 }
  0x4d   : > { %s2044_s20 = scalar_select %p1815_p5, 1, 0 }
  0x4e   : > { %s2045_s18 = scalar_select %p1819_p8, 1, 0 }
  0x4f   : > { %s1184_s23 = sshll.u32 %s1624_s12, 7  ;;  %s331_s21 = scalar_lea.vmem [#allocation2], %s1183_s22 }
  0x50   : > { %s1827_s26 = scalar_lea.hbm %s2018_s0, %s1184_s23  ;;  %s338_s27 = sshll.u32 %s331_s21, 4  ;;  %s339_s27 = int_to_ptr.vmem [resolvable:$true] %s338_s27 }
  0x51   : > { %p1831_p7 = pnand %p1342_p2, %p1802_p12  ;;  %s328_s2 = scalar_lea.sflag [#allocation3], %s327_s17 }
  0x52   : > { %s1524_s3 = scalar_lea.hbm %s1827_s26, 128  ;;  %s1529_s25 = scalar_lea.hbm %s2018_s0, 256 }
  0x53   : > { %p1525_p9 = scmp.ne.s32.totalorder %s1827_s26, %s1524_s3  ;;  %p1526_p10 = pneg %p1831_p7 }
  0x54   : > { %p1530_p0 = scmp.lt.s32.totalorder %s1827_s26, %s2018_s0  ;;  %p1531_p12 = scmp.lt.s32.totalorder %s1529_s25, %s1524_s3 }
  0x55   : > { %p1527_p11 = pnand %p1526_p10, %p1525_p9 }
  0x56   : > { %p1532_p2 = por %p1531_p12, %p1530_p0 }
  0x57   : > { %p1528_p13 = pneg %p1527_p11 }
  0x59   : > { %p1533_p4 = pnand %p1532_p2, %p1528_p13 }
  0x5b   : > { %1536 = shalt.err (!%p1533_p4)
}
  0x5c   : > { %s1537_s13 = scalar_lea.vmem %s339_s27, 128  ;;  %s1632_s17 = smov [#allocation2]  }
  0x5d   : > { %p1538_p1 = scmp.ne.s32.totalorder %s339_s27, %s1537_s13  ;;  %s1542_s5 = sshll.u32 %s1632_s17, 4  ;;  %s1543_s5 = int_to_ptr.vmem [resolvable:$false] %s1542_s5 }
  0x5e   : > { %s1544_s6 = scalar_lea.vmem %s1543_s5, 256  ;;  %p1545_p9 = scmp.lt.s32.totalorder %s339_s27, %s1543_s5 }
  0x5f   : > { %p1540_p8 = pnand %p1538_p1, %p1526_p10  ;;  %p1546_p11 = scmp.lt.s32.totalorder %s1544_s6, %s1537_s13 }
  0x61   : > { %p1541_p5 = pneg %p1540_p8  ;;  %p1547_p6 = por %p1546_p11, %p1545_p9 }
  0x63   : > { %p1548_p3 = pnand %p1547_p6, %p1541_p5 }
  0x65   : > { %1551 = shalt.err (!%p1548_p3)
}
  0x66   : > { %1333 = dma.hbm_to_vmem [thread:$0]  (!%p1831_p7), %s1827_s26, 128, %s339_s27, %s328_s2  }
  0x67   : > { %p2047_p13 = scmp.ne.s32.totalorder %s2036_s16, 0 }
  0x68   : > { %s1852_s3 = sand.u32 (!%p2047_p13), 1, %s1616_s10   ;;  %p2048_p1 = scmp.ne.s32.totalorder (!%p2047_p13), %s2043_s14, 0 }
  0x69   : > { %353 = sbr.rel (%p2047_p13) target bundleno = 1843 (0x733), region = 56  ;;  %s1186_s23 = sshll.u32 (!%p2047_p13), %s1852_s3, 3 }
  0x6a   : > { %s356_s5 = scalar_lea.sflag (!%p2047_p13), [#allocation3], %s1852_s3  ;;  %s359_s6 = scalar_lea.vmem (!%p2047_p13), [#allocation2], %s1186_s23 }
  0x6e   : > { %1595 = dma.done.wait (%p2048_p1), %s356_s5, 128  }
  0x6f   : > { %1597 = vsyncadd (%p2048_p1), %s356_s5, 4294967168  ;;  %p2049_p3 = scmp.eq.s32.totalorder %s1721_s15, 0 }
  0x71   : > { %1599 = dma.done.wait (%p2049_p3), [#allocation6], 528   ;;  %p2050_p4 = pmov %p2049_p3 }
  0x72   : > { %p2051_p6 = pmov %p2049_p3 }
  0x73   : > { %1601 = vsyncadd (%p2050_p4), [#allocation6], 4294966768 }
  0x74   : > { %1603 = dma.done.wait (%p2051_p6), [#allocation9], 528   ;;  %p2052_p5 = pmov %p2049_p3 }
  0x75   : > { %vm420_vm0 = vcmask 261120   ;;  %v1870_v0 = vld [vmem:[%s359_s6] sm:$0xff]  ;;  %v450_v9 = vld [vmem:[#allocation7] sm:$0xff]  ;;  %v1633_v10 = vmov 0.0   ;;  %vm1634_vm1 = vmmov 0   ;;  %s1635_s27 = smov 120  }
  0x76   : > { %1605 = vsyncadd (%p2052_p5), [#allocation9], 4294966768  ;;  %v421_v1 = vsel %vm420_vm0, %v1870_v0, 0.0  ;;  %v452_v7 = vld [vmem:[#allocation7 + $0x10] sm:$0xff]  ;;  %v453_v8 = vld [vmem:[#allocation7 + $0x18] sm:$0xff]  ;;  %1233 = vmatprep.subr.bf16.mxu0 %v1633_v10  ;;  %1237 = vmatprep.mubr.msk.bf16.mxu0 %vm1634_vm1, %v1633_v10  ;;  %s1636_s28 = smov 96  }
  0x77   : > { %422 = vadd.xlane.f32.xlu0 %v421_v1  ;;  %v455_v11 = vpack.c.bf16 %v453_v8, %v452_v7  ;;  %v451_v12 = vld [vmem:[#allocation7 + $0x8] sm:$0xff]  ;;  %1241 = vmatprep.subr.bf16.mxu1 %v1633_v10  ;;  %v1193_v20 = vld [vmem:[#allocation5] ss:$0 sm:$0xff]  ;;  %s1637_s24 = smov 88   ;;  %s1638_s25 = smov 80   ;;  %vm513_vm2 = vcmask 64512  }
  0x78   : > { %1243 = vmatprep.mubr.msk.bf16.mxu1 %vm1634_vm1, %v1633_v10  ;;  %v454_v13 = vpack.c.bf16 %v451_v12, %v450_v9  ;;  %v1192_v18 = vld [vmem:[%s2019_s1] ss:$0 sm:$0xff]  ;;  %s1639_s22 = smov 112   ;;  %s1640_s21 = smov 72   ;;  %vm586_vm4 = vcmask 1043456   ;;  %vm982_vm5 = vcmask 130048  }
  0x79   : > { %1234 = vmatpush3.bf16.msra.mxu0 %v455_v11  ;;  %v1194_v24 = vld [vmem:[%s2022_s4] ss:$0 sm:$0xff]  ;;  %s1641_s13 = smov 104   ;;  %p413_p8 = scmp.lt.s32.totalorder %s1721_s15, 1  ;;  %vm984_vm6 = vcmask 195584  }
  0x7a   : > { %1235 = vmatprep.subr.bf16.mxu0 %v1633_v10  ;;  %v506_v42 = vld [vmem:[%s2025_s7] sm:$0xff]  ;;  %s1642_s26 = smov 64   ;;  %p2053_p10 = scmp.ne.s32.totalorder %s2044_s20, 0 }
  0x7b   : > { %s414_s17 = scalar_select %p413_p8, %s1721_s15, 1  ;;  %vm507_vm3 = vcmp.gt.f32.partialorder %v506_v42, 0.0 }
  0x7d   : > { %1236 = vmatpush3.bf16.msra.mxu0 %v454_v13  ;;  %s415_s14 = scalar_lea.vmem %s2026_s8, %s414_s17  ;;  %s412_s17 = scalar_lea.vmem [#allocation11], %s1186_s23 }
  0x7e   : > { %1247 = vmatprep.subr.bf16.mxu0 %v1633_v10  ;;  %v1197_v45 = vld [vmem:[%s415_s14] ss:$0 sm:$0xff]  ;;  %s1059_s5 = sshll.u32 %s412_s17, 4  ;;  %s1649_s14 = smov [#allocation11]   ;;  %s1976_s5 = int_to_ptr.vmem [resolvable:$true] %s1059_s5 }
  0x7f   : > { %s1552_s23 = scalar_lea.vmem %s1976_s5, 128 }
  0x80   : > { %p1553_p7 = scmp.ne.s32.totalorder %s1976_s5, %s1552_s23 }
  0x82   : > { %p1554_p0 = pnand %p1553_p7, %p2053_p10 }
  0x84   : > { %p1555_p12 = pneg %p1554_p0 }
 0x100   : > { %v423_v2 = vpop.xlane.xlu0 %422 }
 0x101   : > { %v425_v3 = vmul.f32 0.03125, %v423_v2 }
 0x103   : > { %v426_v4 = vsub.f32 %v1870_v0, %v425_v3 }
 0x105   : > { %v427_v5 = vmul.f32 %v426_v4, %v426_v4 }
 0x107   : > { %v428_v6 = vsel %vm420_vm0, %v427_v5, 0.0 }
 0x108   : > { %429 = vadd.xlane.f32.xlu0 %v428_v6 }
 0x191   : > { %v430_v14 = vpop.xlane.xlu0 %429 }
 0x192   : > { %v431_v15 = vmul.f32 0.03125, %v430_v14 }
 0x194   : > { %v432_v16 = vadd.f32 1e-05, %v431_v15 }
 0x196   : > { %1402 = vrsqrt.f32 %v432_v16 }
 0x1a3   : > { %v1403_v17 = vpop.eup %1402 }
 0x1a4   : > { %v434_v19 = vmul.f32 %v1403_v17, %v426_v4 }
 0x1a6   : > { %v441_v21 = vmul.f32 %v1192_v18, %v434_v19 }
 0x1a8   : > { %v448_v22 = vadd.f32 %v1193_v20, %v441_v21 }
 0x1aa   : > { %v449_v23 = vpack.c.bf16 %v448_v22, %v448_v22 }
 0x1ac   : > { %1238 = vmatmul.mubr.msk.bf16.vlgmr.msra.gmra.mxu0 %vm420_vm0, %v449_v23 }
 0x1ad   : > { %1249 = vmatprep.mubr.msk.bf16.mxu0 %vm1634_vm1, %v1633_v10 }
 0x26c   : > { %v500_v25 = vpop.f32.mrf.mxu0 }
 0x26d   : > { %v501_v26 = vadd.f32 %v1194_v24, %v500_v25 }
 0x26e   : > { %v1239_v27 = vpop.f32.mrf.mxu0 }
 0x26f   : > { %v1893_v28 = vpack.c.bf16 %v501_v26, %v501_v26 }
 0x270   : > { %v503_v29 = vpop.f32.mrf.mxu0 }
 0x271   : > { %630 = vrot.lane.b32.xlu0 %v1893_v28, %s1635_s27  ;;  %511 = vrot.lane.b32.xlu1 %v1893_v28, %s1636_s28  ;;  %s1643_s27 = smov 56   ;;  %s1644_s28 = smov 48  }
 0x272   : > { %v1240_v30 = vpop.f32.mrf.mxu0 }
 0x275   : > { %632 = vrot.lane.b32.xlu1 %v1893_v28, %s1637_s24  ;;  %s1645_s24 = smov 40  }
 0x279   : > { %745 = vrot.lane.b32.xlu1 %v1893_v28, %s1638_s25  ;;  %s1646_s25 = smov 8  }
 0x27d   : > { %743 = vrot.lane.b32.xlu1 %v1893_v28, %s1639_s22  ;;  %s1647_s22 = smov 16  }
 0x281   : > { %858 = vrot.lane.b32.xlu1 %v1893_v28, %s1640_s21  ;;  %s1648_s21 = smov 24  }
 0x285   : > { %856 = vrot.lane.b32.xlu1 %v1893_v28, %s1641_s13  ;;  %s1208_s13 = sshll.u32 %s1721_s15, 7  ;;  %s1046_s15 = scalar_lea.sflag [#allocation4], %s1852_s3 }
 0x286   : > { %s1974_s16 = scalar_lea.hbm %s2027_s9, %s1208_s13 }
 0x2e3   : > { %v512_v31 = vpop.permute.xlu1 %511  ;;  %v631_v36 = vpop.permute.xlu0 %630 }
 0x2e4   : > { %v518_v32 = vsel %vm513_vm2, %v512_v31, 0 }
 0x2e5   : > { %1242 = vmatpush3.bf16.xpose.msra.mxu1 %v518_v32 }
 0x2e6   : > { %1253 = vmatprep.subr.bf16.mxu1 %v1633_v10 }
 0x2e7   : > { %v633_v33 = vpop.permute.xlu1 %632 }
 0x2e8   : > { %v638_v34 = vsel %vm513_vm2, %v633_v33, 0 }
 0x2eb   : > { %v746_v35 = vpop.permute.xlu1 %745 }
 0x2ec   : > { %1244 = vmatmul.mubr.msk.bf16.vlgmr.msra.gmra.mxu1 %vm513_vm2, %v1893_v28  ;;  %v751_v38 = vsel %vm513_vm2, %v746_v35, 0 }
 0x2ed   : > { %1254 = vmatpush3.bf16.xpose.msra.mxu1 %v638_v34  ;;  %1255 = vmatprep.mubr.msk.bf16.mxu1 %vm1634_vm1, %v1633_v10 }
 0x2ee   : > { %1265 = vmatprep.subr.bf16.mxu1 %v1633_v10 }
 0x2ef   : > { %v744_v37 = vpop.permute.xlu1 %743 }
 0x2f3   : > { %v859_v39 = vpop.permute.xlu1 %858 }
 0x2f4   : > { %1256 = vmatmul.mubr.msk.bf16.vlgmr.msra.gmra.mxu1 %vm513_vm2, %v631_v36  ;;  %v864_v40 = vsel %vm513_vm2, %v859_v39, 0 }
 0x2f5   : > { %1266 = vmatpush3.bf16.xpose.msra.mxu1 %v751_v38  ;;  %1267 = vmatprep.mubr.msk.bf16.mxu1 %vm1634_vm1, %v1633_v10 }
 0x2f6   : > { %1277 = vmatprep.subr.bf16.mxu1 %v1633_v10 }
 0x2f7   : > { %v857_v41 = vpop.permute.xlu1 %856 }
 0x2fc   : > { %1268 = vmatmul.mubr.msk.bf16.vlgmr.msra.gmra.mxu1 %vm513_vm2, %v744_v37 }
 0x2fd   : > { %1278 = vmatpush3.bf16.xpose.msra.mxu1 %v864_v40  ;;  %1279 = vmatprep.mubr.msk.bf16.mxu1 %vm1634_vm1, %v1633_v10 }
 0x2fe   : > { %1289 = vmatprep.subr.bf16.mxu1 %v1633_v10 }
 0x304   : > { %1280 = vmatmul.mubr.msk.bf16.vlgmr.msra.gmra.mxu1 %vm513_vm2, %v857_v41 }
 0x305   : > { %1293 = vmatprep.mubr.msk.bf16.mxu1 %vm1634_vm1, %v1633_v10 }
 0x3ac   : > { %v554_v43 = vpop.f32.mrf.mxu1 }
 0x3ad   : > { %v560_v44 = vmul.f32 0.35355338, %v554_v43 }
 0x3ae   : > { %v1245_v46 = vpop.f32.mrf.mxu1 }
 0x3af   : > { %v561_v47 = vsel %vm507_vm3, %v560_v44, -10000.0 }
 0x3b0   : > { %v557_v48 = vpop.f32.mrf.mxu1  ;;  %v568_v49 = vadd.f32 %v1197_v45, %v561_v47 }
 0x3b2   : > { %v1246_v50 = vpop.f32.mrf.mxu1  ;;  %v569_v51 = vsel %vm513_vm2, %v568_v49, -inf }
 0x3b3   : > { %570 = vmax.xlane.f32.xlu1 %v569_v51 }
 0x3b4   : > { %v674_v52 = vpop.f32.mrf.mxu1 }
 0x3b5   : > { %v680_v53 = vmul.f32 0.35355338, %v674_v52 }
 0x3b6   : > { %v1257_v54 = vpop.f32.mrf.mxu1 }
 0x3b7   : > { %v681_v55 = vsel %vm507_vm3, %v680_v53, -10000.0 }
 0x3b8   : > { %v677_v56 = vpop.f32.mrf.mxu1  ;;  %v682_v57 = vadd.f32 %v1197_v45, %v681_v55 }
 0x3ba   : > { %v1258_v58 = vpop.f32.mrf.mxu1  ;;  %v683_v59 = vsel %vm513_vm2, %v682_v57, -inf }
 0x3bb   : > { %684 = vmax.xlane.f32.xlu0 %v683_v59 }
 0x3bc   : > { %v787_v60 = vpop.f32.mrf.mxu1 }
 0x3bd   : > { %v793_v61 = vmul.f32 0.35355338, %v787_v60 }
 0x3be   : > { %v1269_v62 = vpop.f32.mrf.mxu1 }
 0x3bf   : > { %v794_v63 = vsel %vm507_vm3, %v793_v61, -10000.0 }
 0x3c0   : > { %v790_v1 = vpop.f32.mrf.mxu1  ;;  %v795_v2 = vadd.f32 %v1197_v45, %v794_v63 }
 0x3c2   : > { %v1270_v3 = vpop.f32.mrf.mxu1  ;;  %v796_v4 = vsel %vm513_vm2, %v795_v2, -inf }
 0x3c3   : > { %797 = vmax.xlane.f32.xlu1 %v796_v4  ;;  %v989_v3 = vld [vmem:[#allocation8 + $0x10] sm:$0xff]  ;;  %v990_v4 = vld [vmem:[#allocation8 + $0x18] sm:$0xff] }
 0x3c4   : > { %v900_v5 = vpop.f32.mrf.mxu1 }
 0x3c5   : > { %v906_v6 = vmul.f32 0.35355338, %v900_v5  ;;  %v987_v5 = vld [vmem:[#allocation8] sm:$0xff] }
 0x3c6   : > { %v1281_v7 = vpop.f32.mrf.mxu1 }
 0x3c7   : > { %v907_v8 = vsel %vm507_vm3, %v906_v6, -10000.0  ;;  %v992_v6 = vpack.c.bf16 %v990_v4, %v989_v3  ;;  %v988_v7 = vld [vmem:[#allocation8 + $0x8] sm:$0xff] }
 0x3c8   : > { %v903_v9 = vpop.f32.mrf.mxu1  ;;  %v908_v11 = vadd.f32 %v1197_v45, %v907_v8  ;;  %v991_v8 = vpack.c.bf16 %v988_v7, %v987_v5 }
 0x3c9   : > { %1290 = vmatpush3.bf16.msra.mxu1 %v992_v6 }
 0x3ca   : > { %v1282_v12 = vpop.f32.mrf.mxu1  ;;  %v909_v13 = vsel %vm513_vm2, %v908_v11, -inf  ;;  %1291 = vmatprep.subr.bf16.mxu1 %v1633_v10 }
 0x3cb   : > { %910 = vmax.xlane.f32.xlu0 %v909_v13 }
 0x3cd   : > { %1292 = vmatpush3.bf16.msra.mxu1 %v991_v8 }
 0x43c   : > { %v571_v14 = vpop.xlane.xlu1 %570 }
 0x43d   : > { %v572_v15 = vsub.f32 %v568_v49, %v571_v14 }
 0x43f   : > { %v573_v16 = vmul.f32 1.442695, %v572_v15 }
 0x441   : > { %1404 = vpow2.f32 %v573_v16 }
 0x444   : > { %v685_v17 = vpop.xlane.xlu0 %684 }
 0x445   : > { %v686_v18 = vsub.f32 %v682_v57, %v685_v17 }
 0x447   : > { %v687_v19 = vmul.f32 1.442695, %v686_v18 }
 0x449   : > { %1406 = vpow2.f32 %v687_v19 }
 0x44c   : > { %v798_v30 = vpop.xlane.xlu1 %797 }
 0x44d   : > { %v799_v31 = vsub.f32 %v795_v2, %v798_v30 }
 0x44e   : > { %v1405_v20 = vpop.eup %1404 }
 0x44f   : > { %v575_v21 = vsel %vm513_vm2, %v1405_v20, 0.0  ;;  %v800_v32 = vmul.f32 1.442695, %v799_v31 }
 0x450   : > { %576 = vadd.xlane.f32.xlu1 %v575_v21 }
 0x454   : > { %v911_v22 = vpop.xlane.xlu0 %910 }
 0x455   : > { %v912_v23 = vsub.f32 %v908_v11, %v911_v22 }
 0x456   : > { %v1407_v24 = vpop.eup %1406 }
 0x457   : > { %v913_v25 = vmul.f32 1.442695, %v912_v23  ;;  %v689_v26 = vsel %vm513_vm2, %v1407_v24, 0.0 }
 0x458   : > { %690 = vadd.xlane.f32.xlu0 %v689_v26 }
 0x459   : > { %1408 = vpow2.f32 %v913_v25 }
 0x45a   : > { %1410 = vpow2.f32 %v800_v32 }
 0x461   : > { %581 = vrot.lane.b32.xlu1 %v1893_v28, %s1642_s26  ;;  %s1556_s26 = sshll.u32 %s1649_s14, 4  ;;  %s1557_s26 = int_to_ptr.vmem [resolvable:$false] %s1556_s26 }
 0x462   : > { %p1559_p2 = scmp.lt.s32.totalorder %s1976_s5, %s1557_s26 }
 0x466   : > { %v1409_v27 = vpop.eup %1408 }
 0x467   : > { %v915_v29 = vsel %vm513_vm2, %v1409_v27, 0.0  ;;  %v1411_v33 = vpop.eup %1410 }
 0x468   : > { %916 = vadd.xlane.f32.xlu0 %v915_v29  ;;  %v802_v34 = vsel %vm513_vm2, %v1411_v33, 0.0 }
 0x47e   : > { %695 = vrot.lane.b32.xlu0 %v1893_v28, %s1643_s27  ;;  %s1558_s27 = scalar_lea.vmem %s1557_s26, 256 }
 0x47f   : > { %p1560_p9 = scmp.lt.s32.totalorder %s1558_s27, %s1552_s23 }
 0x481   : > { %p1561_p11 = por %p1560_p9, %p1559_p2 }
 0x483   : > { %p1562_p13 = pnand %p1561_p11, %p1555_p12 }
 0x485   : > { %803 = vadd.xlane.f32.xlu1 %v802_v34 }
 0x496   : > { %808 = vrot.lane.b32.xlu1 %v1893_v28, %s1644_s28 }
 0x49a   : > { %921 = vrot.lane.b32.xlu1 %v1893_v28, %s1645_s24 }
 0x4d9   : > { %v577_v35 = vpop.xlane.xlu1 %576 }
 0x4da   : > { %1412 = vrcp.f32 %v577_v35 }
 0x4dd   : > { %v582_v36 = vpop.permute.xlu1 %581 }
 0x4de   : > { %v588_v37 = vsel %vm586_vm4, %v582_v36, 0 }
 0x4df   : > { %1248 = vmatpush3.bf16.msra.mxu0 %v588_v37 }
 0x4e0   : > { %1259 = vmatprep.subr.bf16.mxu0 %v1633_v10 }
 0x4e1   : > { %v691_v38 = vpop.xlane.xlu0 %690 }
 0x4e2   : > { %1414 = vrcp.f32 %v691_v38 }
 0x4e7   : > { %v1413_v39 = vpop.eup %1412 }
 0x4e8   : > { %v579_v40 = vmul.f32 %v1413_v39, %v1405_v20 }
 0x4ea   : > { %v580_v41 = vpack.c.bf16 %v579_v40, %v579_v40 }
 0x4ec   : > { %1250 = vmatmul.mubr.msk.bf16.vlgmr.msra.gmra.mxu0 %vm513_vm2, %v580_v41 }
 0x4ed   : > { %1261 = vmatprep.mubr.msk.bf16.mxu0 %vm1634_vm1, %v1633_v10 }
 0x4ef   : > { %v1415_v28 = vpop.eup %1414 }
 0x4f0   : > { %v693_v43 = vmul.f32 %v1415_v28, %v1407_v24  ;;  %v1205_v24 = vld [vmem:[#allocation10] ss:$0 sm:$0xff] }
 0x4f1   : > { %v917_v42 = vpop.xlane.xlu0 %916 }
 0x4f2   : > { %v694_v46 = vpack.c.bf16 %v693_v43, %v693_v43 }
 0x4f5   : > { %v696_v44 = vpop.permute.xlu0 %695 }
 0x4f6   : > { %v701_v45 = vsel %vm586_vm4, %v696_v44, 0 }
 0x4f7   : > { %1260 = vmatpush3.bf16.msra.mxu0 %v701_v45 }
 0x4f8   : > { %1271 = vmatprep.subr.bf16.mxu0 %v1633_v10 }
 0x4fa   : > { %1262 = vmatmul.mubr.msk.bf16.vlgmr.msra.gmra.mxu0 %vm513_vm2, %v694_v46 }
 0x4fb   : > { %1273 = vmatprep.mubr.msk.bf16.mxu0 %vm1634_vm1, %v1633_v10 }
 0x50e   : > { %v804_v47 = vpop.xlane.xlu1 %803 }
 0x50f   : > { %1416 = vrcp.f32 %v804_v47 }
 0x510   : > { %1418 = vrcp.f32 %v917_v42 }
 0x512   : > { %v809_v48 = vpop.permute.xlu1 %808 }
 0x513   : > { %v814_v49 = vsel %vm586_vm4, %v809_v48, 0 }
 0x514   : > { %1272 = vmatpush3.bf16.msra.mxu0 %v814_v49 }
 0x515   : > { %1283 = vmatprep.subr.bf16.mxu0 %v1633_v10 }
 0x516   : > { %v922_v52 = vpop.permute.xlu1 %921 }
 0x517   : > { %v927_v55 = vsel %vm586_vm4, %v922_v52, 0 }
 0x51c   : > { %v1417_v50 = vpop.eup %1416 }
 0x51d   : > { %v806_v51 = vmul.f32 %v1417_v50, %v1411_v33  ;;  %v1419_v54 = vpop.eup %1418 }
 0x51e   : > { %v919_v56 = vmul.f32 %v1419_v54, %v1409_v27 }
 0x51f   : > { %v807_v53 = vpack.c.bf16 %v806_v51, %v806_v51 }
 0x520   : > { %v920_v57 = vpack.c.bf16 %v919_v56, %v919_v56 }
 0x521   : > { %1274 = vmatmul.mubr.msk.bf16.vlgmr.msra.gmra.mxu0 %vm513_vm2, %v807_v53 }
 0x522   : > { %1284 = vmatpush3.bf16.msra.mxu0 %v927_v55  ;;  %1285 = vmatprep.mubr.msk.bf16.mxu0 %vm1634_vm1, %v1633_v10 }
 0x529   : > { %1286 = vmatmul.mubr.msk.bf16.vlgmr.msra.gmra.mxu0 %vm513_vm2, %v920_v57 }
 0x5ac   : > { %v624_v58 = vpop.f32.mrf.mxu0 }
 0x5ae   : > { %v1251_v59 = vpop.f32.mrf.mxu0 }
 0x5b0   : > { %v627_v60 = vpop.f32.mrf.mxu0 }
 0x5b2   : > { %v1252_v61 = vpop.f32.mrf.mxu0 }
 0x5ba   : > { %v737_v62 = vpop.f32.mrf.mxu0 }
 0x5bb   : > { %970 = vrot.lane.b32.xlu0 %v737_v62, %s1646_s25 }
 0x5bc   : > { %v1263_v63 = vpop.f32.mrf.mxu0 }
 0x5be   : > { %v740_v1 = vpop.f32.mrf.mxu0 }
 0x5c0   : > { %v1264_v2 = vpop.f32.mrf.mxu0 }
 0x5e1   : > { %v850_v9 = vpop.f32.mrf.mxu0 }
 0x5e2   : > { %974 = vrot.lane.b32.xlu1 %v850_v9, %s1647_s22 }
 0x5e3   : > { %v1275_v11 = vpop.f32.mrf.mxu0 }
 0x5e5   : > { %v853_v12 = vpop.f32.mrf.mxu0 }
 0x5e7   : > { %v1276_v13 = vpop.f32.mrf.mxu0 }
 0x5e9   : > { %v963_v14 = vpop.f32.mrf.mxu0 }
 0x5ea   : > { %978 = vrot.lane.b32.xlu0 %v963_v14, %s1648_s21 }
 0x5eb   : > { %v1287_v15 = vpop.f32.mrf.mxu0 }
 0x5ed   : > { %v966_v16 = vpop.f32.mrf.mxu0 }
 0x5ef   : > { %v1288_v17 = vpop.f32.mrf.mxu0 }
 0x62d   : > { %v971_v18 = vpop.permute.xlu0 %970 }
 0x62e   : > { %v981_v10 = vsel %vm513_vm2, %v624_v58, %v971_v18 }
 0x654   : > { %v975_v19 = vpop.permute.xlu1 %974 }
 0x655   : > { %v983_v20 = vsel %vm982_vm5, %v981_v10, %v975_v19 }
 0x65c   : > { %v979_v21 = vpop.permute.xlu0 %978 }
 0x65d   : > { %v985_v22 = vsel %vm984_vm6, %v983_v20, %v979_v21 }
 0x65e   : > { %v986_v23 = vpack.c.bf16 %v985_v22, %v985_v22 }
 0x660   : > { %1294 = vmatmul.mubr.msk.bf16.vlgmr.msra.gmra.mxu1 %vm420_vm0, %v986_v23 }
 0x720   : > { %v1037_v25 = vpop.f32.mrf.mxu1 }
 0x721   : > { %v1038_v26 = vadd.f32 %v1205_v24, %v1037_v25 }
 0x722   : > { %v1295_v27 = vpop.f32.mrf.mxu1 }
 0x723   : > { %v1043_v29 = vadd.f32 %v1038_v26, %v1870_v0 }
 0x724   : > { %v1040_v30 = vpop.f32.mrf.mxu1 }
 0x725   : > { %1044 = vst.msk [vmem:[%s412_s17] sm:$0xff] %vm420_vm0, %v1043_v29 }
 0x726   : > { %v1296_v31 = vpop.f32.mrf.mxu1 }
 0x727   : > { %1565 = shalt.err (!%p1562_p13)
}
 0x728   : > { %s1566_s28 = scalar_lea.hbm %s1974_s16, 128  ;;  %s1570_s25 = scalar_lea.hbm %s2027_s9, 256 }
 0x729   : > { %p1567_p1 = scmp.ne.s32.totalorder %s1974_s16, %s1566_s28  ;;  %p1571_p6 = scmp.lt.s32.totalorder %s1974_s16, %s2027_s9 }
 0x72a   : > { %p1572_p5 = scmp.lt.s32.totalorder %s1570_s25, %s1566_s28 }
 0x72b   : > { %p1568_p3 = pnand %p1567_p1, %p2053_p10 }
 0x72c   : > { %p1573_p8 = por %p1572_p5, %p1571_p6 }
 0x72d   : > { %p1569_p4 = pneg %p1568_p3 }
 0x72f   : > { %p1574_p7 = pnand %p1573_p8, %p1569_p4 }
 0x731   : > { %1577 = shalt.err (!%p1574_p7)
}
 0x732   : > { %1315 = dma.vmem_to_hbm [thread:$0]  (%p2053_p10), %s1976_s5, 128, %s1974_s16, %s1046_s15  }
 0x733 PF: > { %s1071_s13 = sand.u32 1, %s1612_s30   ;;  %p2054_p0 = scmp.ne.s32.totalorder %s2045_s18, 0 }
 0x734   : > { %p2055_p12 = scmp.ge.s32.totalorder %s1624_s12, 2  ;;  %s1072_s17 = scalar_lea.sflag [#allocation4], %s1071_s13 }
 0x736   : > { %p1335_p2 = pnand %p2055_p12, %p2054_p0 }
 0x738   : > { %p1336_p9 = pneg %p1335_p2 }
 0x73a   : > { %1607 = dma.done.wait (%p1336_p9), %s1072_s17, 128  }
 0x73b   : > { %1609 = vsyncadd (%p1336_p9), %s1072_s17, 4294967168  ;;  %p24_p11 = scmp.ge.s32.totalorder %s1789_s19, 4   ;;  %s2056_s30 = smov %s1616_s10 }
 0x73c   : > { %s2057_s10 = smov %s1620_s11  ;;  %s2058_s11 = smov %s1800_s29 }
 0x73d   : > { %s2059_s12 = smov %s1789_s19  ;;  %26 = sbr.rel (!%p24_p11) target bundleno = 12 (0xc), region = 120 }
 0x742   :  { %1077 = vsyncpa [#allocation3], 1 }
 0x743   :  { %1079 = vsyncpa [#allocation3 + $0x1], 1 }
 0x744   :  { %1080 = vsyncpa [#allocation6], 1 }
 0x745   :  { %1081 = vsyncpa [#allocation9], 1 }
 0x746   :  { %1082 = vsyncpa [#allocation4], 1 }
 0x747   :  { %1084 = vsyncpa [#allocation4 + $0x1], 1 }

</bundles_post_ra>
